<compile_context>
chip_gen: v7x
topology: tpu7x:2x2x1
jax: 0.10.0
libtpu: 0.0.40
codegen_flags: <defaults>
</compile_context>

<pallas_src>
import math
from functools import partial

import jax
import jax.numpy as jnp
from jax.experimental import pallas as pl
from jax.experimental.pallas import tpu as pltpu

NEG_SLOPE = 0.01  # nn.LeakyReLU default negative_slope


def _leaky_relu(x, negative_slope=NEG_SLOPE):
    # Matches nn.LeakyReLU (x == 0 -> 0 either way).
    return jnp.where(x >= 0, x, negative_slope * x)


def mlp_kernel(x_ref, w1_ref, b1_ref, w2_ref, b2_ref, w3_ref, b3_ref, o_ref):
    # x_ref : (TR, kp*4)   f32  -- "row packed" batch, kp samples per row
    # w1_ref: (kp*4, kp*H) bf16 -- kron(I_kp, w1)
    # b1_ref: (1, kp*H)    f32  -- tile(b1, kp)
    # w2_ref: (kp*H, kp*H) bf16 -- kron(I_kp, w2)
    # b2_ref: (1, kp*H)    f32
    # w3_ref: (kp*H, kp)   bf16 -- kron(I_kp, w3)
    # b3_ref: (1, 1)       f32  -- SMEM scalar
    # o_ref : (TR, kp)     f32
    x = x_ref[...].astype(jnp.bfloat16)

    h1 = jnp.dot(x, w1_ref[...], preferred_element_type=jnp.float32) + b1_ref[...]
    h1 = _leaky_relu(h1).astype(jnp.bfloat16)

    h2 = jnp.dot(h1, w2_ref[...], preferred_element_type=jnp.float32) + b2_ref[...]
    h2 = _leaky_relu(h2).astype(jnp.bfloat16)

    y = jnp.dot(h2, w3_ref[...], preferred_element_type=jnp.float32) + b3_ref[0, 0]
    o_ref[...] = _leaky_relu(y).astype(o_ref.dtype)


@partial(jax.jit, static_argnums=(2, 3))
def _forward_impl(x, params, kp, block_rows):
    B = x.shape[0]
    H = params["w1"].shape[1]
    assert x.shape[1] == 4

    # Pad batch to a multiple of kp (copy only when B % kp != 0; usually no-op).
    B_pad = ((B + kp - 1) // kp) * kp
    if B_pad != B:
        x = jnp.pad(x, ((0, B_pad - B), (0, 0)))
    R = B_pad // kp
    x_r = x.reshape(R, kp * 4)  # layout-preserving reshape -> no HBM pass

    # Rows of the packed view per grid step; the last tile may be partial
    # (Pallas masks out-of-bounds rows on writeback).
    TR = R if R <= block_rows else block_rows
    n_blocks = pl.cdiv(R, TR)

    # Block-diagonal packed weights (bf16 for the MXU), tiled biases (f32).
    eye = jnp.eye(kp, dtype=jnp.float32)
    w1_bd = jnp.kron(eye, params["w1"]).astype(jnp.bfloat16)                 # (kp*4, kp*H)
    w2_bd = jnp.kron(eye, params["w2"]).astype(jnp.bfloat16)                 # (kp*H, kp*H)
    w3_bd = jnp.kron(eye, params["w3"].reshape(H, 1)).astype(jnp.bfloat16)   # (kp*H, kp)
    b1_r = jnp.tile(params["b1"].reshape(1, H), (1, kp))                     # (1, kp*H)
    b2_r = jnp.tile(params["b2"].reshape(1, H), (1, kp))                     # (1, kp*H)
    b3_s = params["b3"].reshape(1, 1)                                        # (1, 1) scalar

    const = lambda i: (0, 0)
    out = pl.pallas_call(
        mlp_kernel,
        out_shape=jax.ShapeDtypeStruct((R, kp), jnp.float32),
        grid=(n_blocks,),
        in_specs=[
            pl.BlockSpec((TR, kp * 4), lambda i: (i, 0)),       # x tile
            pl.BlockSpec((kp * 4, kp * H), const),              # w1 (resident)
            pl.BlockSpec((1, kp * H), const),                   # b1 (resident)
            pl.BlockSpec((kp * H, kp * H), const),              # w2 (resident)
            pl.BlockSpec((1, kp * H), const),                   # b2 (resident)
            pl.BlockSpec((kp * H, kp), const),                  # w3 (resident)
            pl.BlockSpec(memory_space=pltpu.MemorySpace.SMEM),  # b3 scalar
        ],
        out_specs=pl.BlockSpec((TR, kp), lambda i: (i, 0)),
        compiler_params=pltpu.CompilerParams(
            dimension_semantics=("parallel",),
            vmem_limit_bytes=32 * 1024 * 1024,
        ),
    )(x_r, w1_bd, b1_r, w2_bd, b2_r, w3_bd, b3_s)

    # Free reshape back to per-sample layout, drop padding.
    return out.reshape(B_pad, 1)[:B]


def _device_defaults():
    """(pack factor kp, batch elements per tile) tuned per TPU generation."""
    try:
        kind = jax.devices()[0].device_kind.lower()
    except Exception:
        kind = ""
    if "v5 lite" in kind or "v5lite" in kind or "v5e" in kind:
        return 4, 8192   # 128-wide MXU; single TC -> big tiles to amortize step overhead
    if "v7" in kind:
        return 8, 2048   # 256-wide MXU; 2 TCs -> enough tiles to load-balance
    return 8, 8192       # v6e & default: 256-wide MXU, single TC


def leaky_relu_nn_forward(x, params, *, block_b=None, pack=None):
    """x: [B, 4] float32; params: dict of weights/biases.  Returns [B, 1] float32."""
    kp_def, tb_def = _device_defaults()
    kp = pack if pack is not None else kp_def
    tb = block_b if block_b is not None else tb_def
    # Rows of the packed (B/kp, kp*4) view per grid step; keep a multiple of 8.
    block_rows = max(8, (tb // (8 * kp)) * 8)
    return _forward_impl(x, params, kp, block_rows)


def init_params(hidden_nodes, key):
    """Deterministic init mimicking PyTorch's default Linear init:
    U(-1/sqrt(fan_in), 1/sqrt(fan_in)) for weight and bias."""
    def linear_init(k, fan_in, fan_out):
        kw, kb = jax.random.split(k)
        bound = 1.0 / math.sqrt(fan_in)
        w = jax.random.uniform(kw, (fan_in, fan_out), jnp.float32, minval=-bound, maxval=bound)
        b = jax.random.uniform(kb, (1, fan_out), jnp.float32, minval=-bound, maxval=bound)
        return w, b

    k1, k2, k3 = jax.random.split(key, 3)
    w1, b1 = linear_init(k1, 4, hidden_nodes)
    w2, b2 = linear_init(k2, hidden_nodes, hidden_nodes)
    w3, b3 = linear_init(k3, hidden_nodes, 1)
    return {"w1": w1, "b1": b1, "w2": w2, "b2": b2, "w3": w3, "b3": b3}


def reference_forward(x, p):
    h = _leaky_relu(x @ p["w1"] + p["b1"])
    h = _leaky_relu(h @ p["w2"] + p["b2"])
    return _leaky_relu(h @ p["w3"] + p["b3"])


if __name__ == "__main__":
    hidden_nodes = 32

    key = jax.random.PRNGKey(0)
    kx, kparams, kx2 = jax.random.split(key, 3)
    params = init_params(hidden_nodes, kparams)

    # bf16 MXU operands => compare against the f32 reference with a loose
    # tolerance (deliberate precision trade-off per the perf review).
    ATOL, RTOL = 8e-2, 5e-2

    # Small shape consistent with the module: batch=8, 4 input features.
    x = jax.random.normal(kx, (8, 4), dtype=jnp.float32)
    out = jax.block_until_ready(leaky_relu_nn_forward(x, params))
    ref = reference_forward(x, params)
    assert out.shape == (8, 1)
    assert jnp.allclose(out, ref, atol=ATOL, rtol=RTOL)

    # Exercise the multi-tile grid + kp padding + partial-last-tile path.
    x2 = jax.random.normal(kx2, (300, 4), dtype=jnp.float32)
    out2 = jax.block_until_ready(leaky_relu_nn_forward(x2, params, block_b=128))
    ref2 = reference_forward(x2, params)
    assert out2.shape == (300, 1)
    assert jnp.allclose(out2, ref2, atol=ATOL, rtol=RTOL)

    print("KERNEL_OK")
</pallas_src>

<mosaic_0001>
module attributes {stable_mosaic.version = 11 : i64} {
  func.func @mlp_kernel(%arg0: i32, %arg1: memref<1x32xf32, #tpu.memory_space<vmem>>, %arg2: memref<32x256xbf16, #tpu.memory_space<vmem>>, %arg3: memref<1x256xf32, #tpu.memory_space<vmem>>, %arg4: memref<256x256xbf16, #tpu.memory_space<vmem>>, %arg5: memref<1x256xf32, #tpu.memory_space<vmem>>, %arg6: memref<256x8xbf16, #tpu.memory_space<vmem>>, %arg7: memref<1x1xf32, #tpu.memory_space<smem>>, %arg8: memref<1x8xf32, #tpu.memory_space<vmem>>) attributes {dimension_semantics = [#tpu.dimension_semantics<parallel>], iteration_bounds = array<i64: 1>, scalar_prefetch = 0 : i64, scratch_operands = 0 : i64, tpu.core_type = #tpu.core_type<tc>, window_params = [{transform_indices = @transform_0, window_bounds = array<i64: 1, 32>}, {pipeline_mode = #tpu.pipeline_mode<synchronous>, transform_indices = @transform_1, window_bounds = array<i64: 32, 256>}, {pipeline_mode = #tpu.pipeline_mode<synchronous>, transform_indices = @transform_2, window_bounds = array<i64: 1, 256>}, {pipeline_mode = #tpu.pipeline_mode<synchronous>, transform_indices = @transform_3, window_bounds = array<i64: 256, 256>}, {pipeline_mode = #tpu.pipeline_mode<synchronous>, transform_indices = @transform_4, window_bounds = array<i64: 1, 256>}, {pipeline_mode = #tpu.pipeline_mode<synchronous>, transform_indices = @transform_5, window_bounds = array<i64: 256, 8>}, {transform_indices = @transform_6, window_bounds = array<i64: 1, 1>}, {transform_indices = @transform_7, window_bounds = array<i64: 1, 8>}]} {
    %c0 = arith.constant 0 : index
    %c0_0 = arith.constant 0 : index
    %0 = vector.load %arg1[%c0, %c0_0] : memref<1x32xf32, #tpu.memory_space<vmem>>, vector<1x32xf32>
    %1 = arith.truncf %0 : vector<1x32xf32> to vector<1x32xbf16>
    %c0_1 = arith.constant 0 : index
    %c0_2 = arith.constant 0 : index
    %2 = vector.load %arg2[%c0_1, %c0_2] : memref<32x256xbf16, #tpu.memory_space<vmem>>, vector<32x256xbf16>
    %cst = arith.constant dense<0.000000e+00> : vector<1x256xf32>
    %3 = tpu.matmul %1, %2, %cst {dimension_numbers = #tpu.dot_dimension_numbers<[1], [0], [0], [1], [0, 0, 1, 1], [], []>} : vector<1x32xbf16>, vector<32x256xbf16>, vector<1x256xf32> -> vector<1x256xf32>
    %c0_3 = arith.constant 0 : index
    %c0_4 = arith.constant 0 : index
    %4 = vector.load %arg3[%c0_3, %c0_4] : memref<1x256xf32, #tpu.memory_space<vmem>>, vector<1x256xf32>
    %5 = arith.addf %3, %4 : vector<1x256xf32>
    %cst_5 = arith.constant 0.000000e+00 : f32
    %6 = vector.broadcast %cst_5 : f32 to vector<1x256xf32>
    %7 = arith.cmpf oge, %5, %6 : vector<1x256xf32>
    %cst_6 = arith.constant 0.00999999977 : f32
    %8 = vector.broadcast %cst_6 : f32 to vector<1x256xf32>
    %9 = arith.mulf %8, %5 : vector<1x256xf32>
    %10 = arith.select %7, %5, %9 : vector<1x256xi1>, vector<1x256xf32>
    %11 = arith.truncf %10 : vector<1x256xf32> to vector<1x256xbf16>
    %c0_7 = arith.constant 0 : index
    %c0_8 = arith.constant 0 : index
    %12 = vector.load %arg4[%c0_7, %c0_8] : memref<256x256xbf16, #tpu.memory_space<vmem>>, vector<256x256xbf16>
    %cst_9 = arith.constant dense<0.000000e+00> : vector<1x256xf32>
    %13 = tpu.matmul %11, %12, %cst_9 {dimension_numbers = #tpu.dot_dimension_numbers<[1], [0], [0], [1], [0, 0, 1, 1], [], []>} : vector<1x256xbf16>, vector<256x256xbf16>, vector<1x256xf32> -> vector<1x256xf32>
    %c0_10 = arith.constant 0 : index
    %c0_11 = arith.constant 0 : index
    %14 = vector.load %arg5[%c0_10, %c0_11] : memref<1x256xf32, #tpu.memory_space<vmem>>, vector<1x256xf32>
    %15 = arith.addf %13, %14 : vector<1x256xf32>
    %cst_12 = arith.constant 0.000000e+00 : f32
    %16 = vector.broadcast %cst_12 : f32 to vector<1x256xf32>
    %17 = arith.cmpf oge, %15, %16 : vector<1x256xf32>
    %cst_13 = arith.constant 0.00999999977 : f32
    %18 = vector.broadcast %cst_13 : f32 to vector<1x256xf32>
    %19 = arith.mulf %18, %15 : vector<1x256xf32>
    %20 = arith.select %17, %15, %19 : vector<1x256xi1>, vector<1x256xf32>
    %21 = arith.truncf %20 : vector<1x256xf32> to vector<1x256xbf16>
    %c0_14 = arith.constant 0 : index
    %c0_15 = arith.constant 0 : index
    %22 = vector.load %arg6[%c0_14, %c0_15] : memref<256x8xbf16, #tpu.memory_space<vmem>>, vector<256x8xbf16>
    %cst_16 = arith.constant dense<0.000000e+00> : vector<1x8xf32>
    %23 = tpu.matmul %21, %22, %cst_16 {dimension_numbers = #tpu.dot_dimension_numbers<[1], [0], [0], [1], [0, 0, 1, 1], [], []>} : vector<1x256xbf16>, vector<256x8xbf16>, vector<1x8xf32> -> vector<1x8xf32>
    %c0_17 = arith.constant 0 : index
    %c0_18 = arith.constant 0 : index
    %24 = memref.load %arg7[%c0_17, %c0_18] : memref<1x1xf32, #tpu.memory_space<smem>>
    %25 = vector.broadcast %24 : f32 to vector<1x8xf32>
    %26 = arith.addf %23, %25 : vector<1x8xf32>
    %cst_19 = arith.constant 0.000000e+00 : f32
    %27 = vector.broadcast %cst_19 : f32 to vector<1x8xf32>
    %28 = arith.cmpf oge, %26, %27 : vector<1x8xf32>
    %cst_20 = arith.constant 0.00999999977 : f32
    %29 = vector.broadcast %cst_20 : f32 to vector<1x8xf32>
    %30 = arith.mulf %29, %26 : vector<1x8xf32>
    %31 = arith.select %28, %26, %30 : vector<1x8xi1>, vector<1x8xf32>
    %c0_21 = arith.constant 0 : index
    %c0_22 = arith.constant 0 : index
    %32 = vector.load %arg8[%c0_21, %c0_22] : memref<1x8xf32, #tpu.memory_space<vmem>>, vector<1x8xf32>
    tpu.vector_store %arg8[%c0_21, %c0_22], %31 {strides = array<i32>} : memref<1x8xf32, #tpu.memory_space<vmem>>, vector<1x8xf32>,
    return
  }
  func.func @transform_0(%arg0: i32) -> (i32, i32) {
    %c0_i32 = arith.constant 0 : i32
    %c0_i32_0 = arith.constant 0 : i32
    return %arg0, %c0_i32 : i32, i32
  }
  func.func @transform_1(%arg0: i32) -> (i32, i32) {
    %c0_i32 = arith.constant 0 : i32
    %c0_i32_0 = arith.constant 0 : i32
    %c0_i32_1 = arith.constant 0 : i32
    return %c0_i32, %c0_i32_0 : i32, i32
  }
  func.func @transform_2(%arg0: i32) -> (i32, i32) {
    %c0_i32 = arith.constant 0 : i32
    %c0_i32_0 = arith.constant 0 : i32
    %c0_i32_1 = arith.constant 0 : i32
    return %c0_i32, %c0_i32_0 : i32, i32
  }
  func.func @transform_3(%arg0: i32) -> (i32, i32) {
    %c0_i32 = arith.constant 0 : i32
    %c0_i32_0 = arith.constant 0 : i32
    %c0_i32_1 = arith.constant 0 : i32
    return %c0_i32, %c0_i32_0 : i32, i32
  }
  func.func @transform_4(%arg0: i32) -> (i32, i32) {
    %c0_i32 = arith.constant 0 : i32
    %c0_i32_0 = arith.constant 0 : i32
    %c0_i32_1 = arith.constant 0 : i32
    return %c0_i32, %c0_i32_0 : i32, i32
  }
  func.func @transform_5(%arg0: i32) -> (i32, i32) {
    %c0_i32 = arith.constant 0 : i32
    %c0_i32_0 = arith.constant 0 : i32
    %c0_i32_1 = arith.constant 0 : i32
    return %c0_i32, %c0_i32_0 : i32, i32
  }
  func.func @transform_6(%arg0: i32) -> (i32, i32) {
    %c0_i32 = arith.constant 0 : i32
    %c0_i32_0 = arith.constant 0 : i32
    %c0_i32_1 = arith.constant 0 : i32
    return %c0_i32, %c0_i32_0 : i32, i32
  }
  func.func @transform_7(%arg0: i32) -> (i32, i32) {
    %c0_i32 = arith.constant 0 : i32
    %c0_i32_0 = arith.constant 0 : i32
    return %arg0, %c0_i32 : i32, i32
  }
}

</mosaic_0001>

<bundles_post_ra>
// kernel: _forward_impl.1
= control target key start
LH: loop header
LB: loop body
LE: loop exit
PB: predicated region body
PF: predicated region fallthrough
CT: control target
= control target key end

     0   :  { %v733_v2 = vmov 0   ;;  %vm67_vm0 = vcmask 261120   ;;  %s955_s0 = inlined_call_operand.vmem [shape: f32[1,32], index: 0, kind: input, shape index: {}]   ;;  %s956_s1 = inlined_call_operand.vmem [shape: bf16[32,256], index: 1, kind: input, shape index: {}]   ;;  %s957_s2 = inlined_call_operand.vmem [shape: f32[1,256], index: 2, kind: input, shape index: {}]   ;;  %s958_s3 = inlined_call_operand.vmem [shape: bf16[256,256], index: 3, kind: input, shape index: {}]   ;;  %s959_s4 = inlined_call_operand.vmem [shape: f32[1,256], index: 4, kind: input, shape index: {}]   ;;  %s960_s5 = inlined_call_operand.vmem [shape: bf16[256,8], index: 5, kind: input, shape index: {}]   ;;  %s961_s6 = inlined_call_operand.<no memory space> [shape: f32[1,1], index: 6, kind: input, shape index: {}]   ;;  %s962_s7 = inlined_call_operand.hbm [shape: f32[1,8], index: 7, kind: output, shape index: {}]  }
   0x1   :  { %v639_v0 = vld [vmem:[%s956_s1 + $0x4] ss:$8 sps:$4 sm:$0xff]   ;;  %v641_v1 = vld [vmem:[%s956_s1] ss:$8 sps:$4 sm:$0xff]   ;;  %103 = vmatprep.mubr.bf16.mxu0 %v733_v2  ;;  %v642_v3 = vld [vmem:[%s956_s1 + $0x14] ss:$8 sps:$4 sm:$0xff]  }
   0x2   :  { %71 = vmatprep.subr.bf16.mxu0 %v639_v0  ;;  %v644_v4 = vld [vmem:[%s956_s1 + $0x10] ss:$8 sps:$4 sm:$0xff]   ;;  %v29_v5 = vld [vmem:[%s955_s0] sm:$0x1]  ;;  %v645_v6 = vld [vmem:[%s958_s3 + $0x4] ss:$8 sps:$4 sm:$0xff]  }
   0x3   :  { %72 = vmatpush1.bf16.msra.mxu0 %v641_v1  ;;  %v647_v7 = vld [vmem:[%s958_s3] ss:$8 sps:$4 sm:$0xff]   ;;  %324 = vmatprep.subr.bf16.mxu1 %v645_v6  ;;  %v648_v8 = vld [vmem:[%s958_s3 + $0x14] ss:$8 sps:$4 sm:$0xff]   ;;  %v30_v9 = vpack.c.bf16 %v29_v5, %v29_v5  ;;  %v650_v10 = vld [vmem:[%s958_s3 + $0x10] ss:$8 sps:$4 sm:$0xff]  }
   0x4   :  { %73 = vmatprep.subr.bf16.mxu0 %v642_v3  ;;  %325 = vmatpush1.bf16.msra.mxu1 %v647_v7  ;;  %v651_v11 = vld [vmem:[%s958_s3 + $0x24] ss:$8 sps:$4 sm:$0xff]   ;;  %v653_v12 = vld [vmem:[%s958_s3 + $0x20] ss:$8 sps:$4 sm:$0xff]   ;;  %v654_v13 = vld [vmem:[%s958_s3 + $0x34] ss:$8 sps:$4 sm:$0xff]  }
   0x5   :  { %326 = vmatprep.subr.bf16.mxu1 %v648_v8  ;;  %v656_v14 = vld [vmem:[%s958_s3 + $0x30] ss:$8 sps:$4 sm:$0xff]   ;;  %v657_v15 = vld [vmem:[%s958_s3 + $0x44] ss:$8 sps:$4 sm:$0xff]   ;;  %v659_v16 = vld [vmem:[%s958_s3 + $0x40] ss:$8 sps:$4 sm:$0xff]  }
   0x6   :  { %v660_v17 = vld [vmem:[%s958_s3 + $0x54] ss:$8 sps:$4 sm:$0xff]   ;;  %v662_v18 = vld [vmem:[%s958_s3 + $0x50] ss:$8 sps:$4 sm:$0xff]   ;;  %v663_v19 = vld [vmem:[%s958_s3 + $0x64] ss:$8 sps:$4 sm:$0xff]  }
   0x7   :  { %74 = vmatpush1.bf16.msra.mxu0 %v644_v4  ;;  %v665_v20 = vld [vmem:[%s958_s3 + $0x60] ss:$8 sps:$4 sm:$0xff]   ;;  %v666_v21 = vld [vmem:[%s958_s3 + $0x74] ss:$8 sps:$4 sm:$0xff]   ;;  %v668_v22 = vld [vmem:[%s958_s3 + $0x70] ss:$8 sps:$4 sm:$0xff]  }
   0x8   :  { %327 = vmatpush1.bf16.msra.mxu1 %v650_v10  ;;  %v669_v23 = vld [vmem:[%s958_s3 + $0x84] ss:$8 sps:$4 sm:$0xff]   ;;  %v671_v24 = vld [vmem:[%s958_s3 + $0x80] ss:$8 sps:$4 sm:$0xff]  }
   0x9   :  { %328 = vmatprep.subr.bf16.mxu1 %v651_v11 }
   0xa   :  { %566 = vmatmul.mubr.msk.bf16.vlgmr.msra.gmra.mrb[0].mxu0 %vm67_vm0, %v30_v9 }
   0xc   :  { %329 = vmatpush1.bf16.msra.mxu1 %v653_v12 }
   0xd   :  { %330 = vmatprep.subr.bf16.mxu1 %v654_v13 }
  0x10   :  { %331 = vmatpush1.bf16.msra.mxu1 %v656_v14 }
  0x11   :  { %332 = vmatprep.subr.bf16.mxu1 %v657_v15 }
  0x14   :  { %333 = vmatpush1.bf16.msra.mxu1 %v659_v16 }
  0x15   :  { %334 = vmatprep.subr.bf16.mxu1 %v660_v17 }
  0x18   :  { %335 = vmatpush1.bf16.msra.mxu1 %v662_v18 }
  0x19   :  { %336 = vmatprep.subr.bf16.mxu1 %v663_v19 }
  0x1c   :  { %337 = vmatpush1.bf16.msra.mxu1 %v665_v20 }
  0x1d   :  { %338 = vmatprep.subr.bf16.mxu1 %v666_v21 }
  0x20   :  { %339 = vmatpush1.bf16.msra.mxu1 %v668_v22 }
  0x21   :  { %13 = vsyncpa [#allocation4], 0  ;;  %340 = vmatprep.subr.bf16.mxu1 %v669_v23  ;;  %v672_v25 = vld [vmem:[%s958_s3 + $0x94] ss:$8 sps:$4 sm:$0xff]   ;;  %v674_v26 = vld [vmem:[%s958_s3 + $0x90] ss:$8 sps:$4 sm:$0xff]   ;;  %v57_v51 = vlaneseq }
  0x22   :  { %v675_v27 = vld [vmem:[%s958_s3 + $0xa4] ss:$8 sps:$4 sm:$0xff]   ;;  %v677_v28 = vld [vmem:[%s958_s3 + $0xa0] ss:$8 sps:$4 sm:$0xff]   ;;  %v678_v29 = vld [vmem:[%s958_s3 + $0xb4] ss:$8 sps:$4 sm:$0xff]  }
  0x23   :  { %v680_v30 = vld [vmem:[%s958_s3 + $0xb0] ss:$8 sps:$4 sm:$0xff]   ;;  %v681_v31 = vld [vmem:[%s958_s3 + $0xc4] ss:$8 sps:$4 sm:$0xff]   ;;  %v683_v32 = vld [vmem:[%s958_s3 + $0xc0] ss:$8 sps:$4 sm:$0xff]  }
  0x24   :  { %341 = vmatpush1.bf16.msra.mxu1 %v671_v24  ;;  %v684_v33 = vld [vmem:[%s958_s3 + $0xd4] ss:$8 sps:$4 sm:$0xff]   ;;  %v686_v34 = vld [vmem:[%s958_s3 + $0xd0] ss:$8 sps:$4 sm:$0xff]   ;;  %v687_v35 = vld [vmem:[%s958_s3 + $0xe4] ss:$8 sps:$4 sm:$0xff]  }
  0x25   :  { %342 = vmatprep.subr.bf16.mxu1 %v672_v25  ;;  %v689_v36 = vld [vmem:[%s958_s3 + $0xe0] ss:$8 sps:$4 sm:$0xff]   ;;  %v690_v37 = vld [vmem:[%s958_s3 + $0xf4] ss:$8 sps:$4 sm:$0xff]   ;;  %v692_v38 = vld [vmem:[%s958_s3 + $0xf0] ss:$8 sps:$4 sm:$0xff]  }
  0x26   :  { %v693_v39 = vld [vmem:[%s960_s5 + $0x40] sm:$0xff]   ;;  %v695_v41 = vld [vmem:[%s960_s5 + $0x48] sm:$0xff]   ;;  %v697_v43 = vld [vmem:[%s960_s5 + $0x50] sm:$0xff]   ;;  %v58_v52 = vshrl.u32 %v57_v51, 7  ;;  %s734_s8 = smov [#allocation3]   ;;  %vm546_vm6 = vcmask 57344  }
  0x27   :  { %v694_v40 = vld [vmem:[%s960_s5] sm:$0xff]   ;;  %615 = vmatprep.subr.bf16.mxu0 %v693_v39  ;;  %v696_v42 = vld [vmem:[%s960_s5 + $0x8] sm:$0xff]   ;;  %v698_v44 = vld [vmem:[%s960_s5 + $0x10] sm:$0xff]   ;;  %s554_s9 = sshll.u32 %s734_s8, 4  ;;  %s555_s9 = int_to_ptr.vmem [resolvable:$true] %s554_s9 }
  0x28   :  { %343 = vmatpush1.bf16.msra.mxu1 %v674_v26  ;;  %616 = vmatpush3.bf16.msra.mxu0 %v694_v40  ;;  %v699_v45 = vld [vmem:[%s960_s5 + $0x58] sm:$0xff]   ;;  %v701_v47 = vld [vmem:[%s960_s5 + $0x60] sm:$0xff]   ;;  %v703_v49 = vld [vmem:[%s960_s5 + $0x68] sm:$0xff]   ;;  %v59_v53 = vsub.s32 0, %v58_v52  ;;  %v63_v55 = vsub.s32 1, %v58_v52  ;;  %v406_v26 = vstv %s961_s6  ;;  %s709_s10 = scalar_lea.vmem %s555_s9, 16  ;;  %p714_p1 = scmp.lt.s32.totalorder %s555_s9, %s555_s9 }
  0x29   :  { %344 = vmatprep.subr.bf16.mxu1 %v675_v27  ;;  %617 = vmatprep.subr.bf16.mxu0 %v695_v41  ;;  %v700_v46 = vld [vmem:[%s960_s5 + $0x18] sm:$0xff]   ;;  %v702_v48 = vld [vmem:[%s960_s5 + $0x20] sm:$0xff]   ;;  %v704_v50 = vld [vmem:[%s960_s5 + $0x28] sm:$0xff]   ;;  %p710_p0 = scmp.ne.s32.totalorder %s555_s9, %s709_s10  ;;  %s713_s11 = scalar_lea.vmem %s555_s9, 32 }
  0x2a   :  { %v35_v54 = vld [vmem:[%s957_s2] sm:$0x3]  ;;  %v705_v6 = vld [vmem:[%s960_s5 + $0x70] sm:$0xff]   ;;  %v707_v8 = vld [vmem:[%s960_s5 + $0x78] sm:$0xff]   ;;  %p715_p2 = scmp.lt.s32.totalorder %s713_s11, %s709_s10 }
  0x2b   :  { %v60_v56 = vrot.slane %v35_v54, %v59_v53  ;;  %v64_v57 = vrot.slane %v35_v54, %v63_v55  ;;  %v706_v7 = vld [vmem:[%s960_s5 + $0x30] sm:$0xff]   ;;  %v708_v9 = vld [vmem:[%s960_s5 + $0x38] sm:$0xff]   ;;  %v152_v10 = vld [vmem:[%s959_s4] sm:$0x3] }
  0x2c   :  { %345 = vmatpush1.bf16.msra.mxu1 %v677_v28  ;;  %618 = vmatpush3.bf16.msra.mxu0 %v696_v42  ;;  %v317_v11 = vrot.slane %v152_v10, %v59_v53  ;;  %v321_v12 = vrot.slane %v152_v10, %v63_v55  ;;  %p716_p3 = por %p715_p2, %p714_p1 }
  0x2d   :  { %346 = vmatprep.subr.bf16.mxu1 %v678_v29  ;;  %619 = vmatprep.subr.bf16.mxu0 %v697_v43 }
  0x2e   :  { %p717_p4 = pnand %p716_p3, %p710_p0 }
  0x30   :  { %347 = vmatpush1.bf16.msra.mxu1 %v680_v30  ;;  %620 = vmatpush3.bf16.msra.mxu0 %v698_v44 }
  0x31   :  { %348 = vmatprep.subr.bf16.mxu1 %v681_v31  ;;  %621 = vmatprep.subr.bf16.mxu0 %v699_v45 }
  0x34   :  { %349 = vmatpush1.bf16.msra.mxu1 %v683_v32  ;;  %622 = vmatpush3.bf16.msra.mxu0 %v700_v46 }
  0x35   :  { %350 = vmatprep.subr.bf16.mxu1 %v684_v33  ;;  %623 = vmatprep.subr.bf16.mxu0 %v701_v47 }
  0x38   :  { %351 = vmatpush1.bf16.msra.mxu1 %v686_v34  ;;  %624 = vmatpush3.bf16.msra.mxu0 %v702_v48 }
  0x39   :  { %352 = vmatprep.subr.bf16.mxu1 %v687_v35  ;;  %625 = vmatprep.subr.bf16.mxu0 %v703_v49 }
  0x3c   :  { %353 = vmatpush1.bf16.msra.mxu1 %v689_v36  ;;  %626 = vmatpush3.bf16.msra.mxu0 %v704_v50 }
  0x3d   :  { %354 = vmatprep.subr.bf16.mxu1 %v690_v37  ;;  %627 = vmatprep.subr.bf16.mxu0 %v705_v6 }
  0x40   :  { %355 = vmatpush1.bf16.msra.mxu1 %v692_v38  ;;  %628 = vmatpush3.bf16.msra.mxu0 %v706_v7 }
  0x41   :  { %629 = vmatprep.subr.bf16.mxu0 %v707_v8 }
  0x44   :  { %630 = vmatpush3.bf16.msra.mxu0 %v708_v9 }
  0xdd   :  { %v105_v58 = vpop.f32.mrb[0].mxu0 }
  0xde   :  { %v106_v59 = vadd.f32 %v105_v58, %v60_v56  ;;  %v107_v60 = vpop.f32.mrb[1].mxu0 }
  0xdf   :  { %v108_v61 = vadd.f32 %v107_v60, %v64_v57  ;;  %v109_v62 = vpop.f32.mrb[2].mxu0 }
  0xe0   :  { %vm112_vm1 = vcmp.ge.f32.partialorder %v106_v59, 0.0  ;;  %v114_v63 = vmul.f32 0.01, %v106_v59  ;;  %v110_v0 = vpop.f32.mrb[3].mxu0 }
  0xe1   :  { %vm113_vm2 = vcmp.ge.f32.partialorder %v108_v61, 0.0  ;;  %v115_v1 = vmul.f32 0.01, %v108_v61 }
  0xe2   :  { %v116_v2 = vsel %vm112_vm1, %v106_v59, %v114_v63 }
  0xe3   :  { %v117_v3 = vsel %vm113_vm2, %v108_v61, %v115_v1  ;;  %v118_v5 = vpack.c.bf16 %v116_v2, %v116_v2 }
  0xe4   :  { %v119_v4 = vpack.c.bf16 %v117_v3, %v117_v3 }
  0xe6   :  { %356 = vmatprep.mubr.bf16.mxu1 %v119_v4 }
  0xe7   :  { %357 = vmatmul.mubr.bf16.vlgmr.msra.gmra.mrb[0].mxu1 %v118_v5 }
 0x1ba   :  { %v358_v13 = vpop.f32.mrb[0].mxu1 }
 0x1bb   :  { %v359_v14 = vadd.f32 %v358_v13, %v317_v11  ;;  %v360_v15 = vpop.f32.mrb[1].mxu1 }
 0x1bc   :  { %v361_v16 = vadd.f32 %v360_v15, %v321_v12  ;;  %v362_v17 = vpop.f32.mrb[2].mxu1 }
 0x1bd   :  { %vm365_vm3 = vcmp.ge.f32.partialorder %v359_v14, 0.0  ;;  %v367_v18 = vmul.f32 0.01, %v359_v14  ;;  %v363_v19 = vpop.f32.mrb[3].mxu1 }
 0x1be   :  { %vm366_vm4 = vcmp.ge.f32.partialorder %v361_v16, 0.0  ;;  %v368_v20 = vmul.f32 0.01, %v361_v16 }
 0x1bf   :  { %v369_v21 = vsel %vm365_vm3, %v359_v14, %v367_v18 }
 0x1c0   :  { %v370_v22 = vsel %vm366_vm4, %v361_v16, %v368_v20  ;;  %v371_v24 = vpack.c.bf16 %v369_v21, %v369_v21 }
 0x1c1   :  { %v372_v23 = vpack.c.bf16 %v370_v22, %v370_v22 }
 0x1c3   :  { %535 = vmatprep.mubr.bf16.mxu0 %v372_v23 }
 0x1c4   :  { %536 = vmatmul.mubr.bf16.vlgmr.msra.gmra.mrb[4].mxu0 %v371_v24 }
 0x297   :  { %v631_v25 = vpop.f32.mrb[4].mxu0 }
 0x298   :  { %v632_v27 = vpop.f32.mrb[5].mxu0 }
 0x299   :  { %v633_v28 = vadd.f32 %v632_v27, %v631_v25  ;;  %v634_v29 = vpop.f32.mrb[6].mxu0 }
 0x29a   :  { %v635_v30 = vpop.f32.mrb[7].mxu0 }
 0x29b   :  { %v538_v31 = vadd.f32 %v633_v28, %v406_v26 }
 0x29d   :  { %v544_v32 = vmul.f32 0.01, %v538_v31  ;;  %vm543_vm5 = vcmp.ge.f32.partialorder %v538_v31, 0.0 }
 0x29f   :  { %v545_v33 = vsel %vm543_vm5, %v538_v31, %v544_v32 }
 0x2a0   :  { %547 = vst.msk [vmem:[#allocation3] sm:$0x1] %vm546_vm6, %v545_v33 }
 0x2a1   :  { %720 = shalt.err (!%p717_p4)
}
 0x2a2   :  { %s721_s13 = scalar_lea.hbm %s962_s7, 16 }
 0x2a3   :  { %p722_p5 = scmp.ne.s32.totalorder %s962_s7, %s721_s13  ;;  %p725_p6 = scmp.lt.u32.totalorder %s721_s13, %s962_s7 }
 0x2a5   :  { %p727_p7 = pnand %p725_p6, %p722_p5 }
 0x2a7   :  { %730 = shalt.err (!%p727_p7)
}
 0x2a8   :  { %557 = dma.vmem_to_hbm [thread:$0]  %s555_s9, 16, %s962_s7, [#allocation4]  }
 0x2a9   :  { %731 = dma.done.wait [#allocation4], 16  }
 0x2aa   :  { %732 = vsyncadd [#allocation4], 4294967280 }
 0x2ab   :  { %561 = vsyncpa [#allocation4], 1 }

</bundles_post_ra>
